<compile_context>
chip_gen: v7x
topology: tpu7x:2x2x1
jax: 0.10.0
libtpu: 0.0.40
codegen_flags: <defaults>
</compile_context>

<pallas_src>
import jax
import jax.numpy as jnp
from jax.experimental import pallas as pl
from jax.experimental.pallas import tpu as pltpu

LANE = 128      # vreg lane width  -> padded class dimension
SUBLANE = 8     # vreg sublane count -> minimum batch tile granularity


def _round_up(x, m):
    return ((x + m - 1) // m) * m


def simple_nn_kernel(x_ref, w1_ref, b1_ref, w2_ref, b2_ref, o_ref):
    # fc1 + ReLU: bf16 MXU matmul, f32 accumulate, f32 bias / activation.
    h = jnp.dot(x_ref[...], w1_ref[...],
                preferred_element_type=jnp.float32) + b1_ref[...]
    h = jnp.maximum(h, 0.0)

    # fc2: class dim pre-padded to LANE; pad columns carry a -1e30 bias so the
    # row max is always a real column and exp() underflows pads to exactly 0.
    logits = jnp.dot(h.astype(w2_ref.dtype), w2_ref[...],
                     preferred_element_type=jnp.float32) + b2_ref[...]

    # LogSoftmax over the class axis — full 128-lane XLU reductions, all f32.
    m = jnp.max(logits, axis=-1, keepdims=True)
    shifted = logits - m
    lse = jnp.log(jnp.sum(jnp.exp(shifted), axis=-1, keepdims=True))
    o_ref[...] = (shifted - lse).astype(o_ref.dtype)


def prepare_params(w1, b1, w2, b2, *, compute_dtype=jnp.bfloat16):
    """One-time weight preprocessing, hoisted out of the forward path.

    w1: [in, H]; b1: [H]; w2: [H, C]; b2: [C]. Weights are feature-major
    ([in, out]) i.e. PyTorch's W.T, so the kernel computes x @ W + b exactly
    like nn.Linear.
    """
    IN, H = w1.shape
    C = w2.shape[1]
    C_pad = max(LANE, _round_up(C, LANE))

    w1_c = jnp.asarray(w1, compute_dtype)
    b1_r = jnp.asarray(b1, jnp.float32).reshape(1, H)
    # Padded class columns: zero weights + huge negative bias (exact in LSE).
    w2_p = jnp.zeros((H, C_pad), compute_dtype).at[:, :C].set(
        jnp.asarray(w2, compute_dtype))
    b2_p = jnp.full((1, C_pad), -1e30, jnp.float32).at[:, :C].set(
        jnp.asarray(b2, jnp.float32))
    return {"w1": w1_c, "b1": b1_r, "w2": w2_p, "b2": b2_p,
            "num_classes": C, "compute_dtype": compute_dtype}


def _choose_batch_tiling(B, block_b):
    """Pick (row_tile, padded_batch) with bounded padding and >=2 grid steps
    when there is enough work (keeps both v7x TensorCores busy)."""
    B8 = _round_up(B, SUBLANE)                 # pad batch to sublanes only
    n_steps = max(1, -(-B8 // block_b))
    if n_steps == 1 and B8 >= 2 * SUBLANE:
        n_steps = 2                            # v7x megacore: 2 parallel steps
    tb = _round_up(-(-B8 // n_steps), SUBLANE)
    return tb, n_steps * tb


def simple_nn_forward(x, params, *, block_b=1024, out_dtype=jnp.float32,
                      return_padded=False):
    """x: [B, in]; params: output of prepare_params()."""
    B, IN = x.shape
    w1, b1, w2, b2 = params["w1"], params["b1"], params["w2"], params["b2"]
    C = params["num_classes"]
    cdt = params["compute_dtype"]
    H = w1.shape[1]
    C_pad = w2.shape[1]

    TB, B_pad = _choose_batch_tiling(B, block_b)
    x_c = x.astype(cdt)
    if B_pad != B:                             # skip pad-copy when unnecessary
        x_c = jnp.zeros((B_pad, IN), cdt).at[:B].set(x_c)

    out_padded = pl.pallas_call(
        simple_nn_kernel,
        out_shape=jax.ShapeDtypeStruct((B_pad, C_pad), out_dtype),
        grid=(B_pad // TB,),
        in_specs=[
            pl.BlockSpec((TB, IN), lambda i: (i, 0)),    # x row tile (pipelined)
            # Weights/biases: constant index_map -> fetched once, VMEM-resident
            # across all grid steps. (pl.Buffered(1) would halve their buffer
            # footprint; irrelevant at H=128 / C_pad=128, so left default.)
            pl.BlockSpec((IN, H), lambda i: (0, 0)),     # w1
            pl.BlockSpec((1, H), lambda i: (0, 0)),      # b1
            pl.BlockSpec((H, C_pad), lambda i: (0, 0)),  # w2 (padded)
            pl.BlockSpec((1, C_pad), lambda i: (0, 0)),  # b2 (padded)
        ],
        out_specs=pl.BlockSpec((TB, C_pad), lambda i: (i, 0)),
        compiler_params=pltpu.CompilerParams(
            dimension_semantics=("parallel",)),
    )(x_c, w1, b1, w2, b2)
    # TODO(synk): for very large class counts (C_pad in the thousands) add a
    # class-dim "arbitrary" grid axis with an online (running max/sum) LSE so
    # w2 need not stay fully VMEM-resident.

    if return_padded:
        # Lane-dense [B_pad, C_pad] slab (rows >= B / cols >= C are padding);
        # skips the extra HBM slice pass — consumer indexes directly.
        return out_padded
    return out_padded[:B, :C]


def reference_forward(x, w1, b1, w2, b2, compute_dtype=jnp.float32):
    b1 = jnp.asarray(b1, jnp.float32).reshape(1, -1)
    b2 = jnp.asarray(b2, jnp.float32).reshape(1, -1)
    h = jnp.dot(x.astype(compute_dtype), w1.astype(compute_dtype),
                preferred_element_type=jnp.float32) + b1
    h = jnp.maximum(h, 0.0)
    logits = jnp.dot(h.astype(compute_dtype), w2.astype(compute_dtype),
                     preferred_element_type=jnp.float32) + b2
    return jax.nn.log_softmax(logits, axis=1)


if __name__ == "__main__":
    B = 2
    INPUT_SIZE = 32
    HIDDEN = 128
    NUM_CLASSES = 8

    key = jax.random.PRNGKey(0)
    kx, k1, k2, k3, k4 = jax.random.split(key, 5)

    x = jax.random.normal(kx, (B, INPUT_SIZE), dtype=jnp.float32)

    # Deterministic init matching PyTorch Linear's default bound 1/sqrt(fan_in)
    bound1 = 1.0 / jnp.sqrt(INPUT_SIZE)
    w1 = jax.random.uniform(k1, (INPUT_SIZE, HIDDEN), jnp.float32, -bound1, bound1)
    b1 = jax.random.uniform(k2, (HIDDEN,), jnp.float32, -bound1, bound1)

    bound2 = 1.0 / jnp.sqrt(HIDDEN)
    w2 = jax.random.uniform(k3, (HIDDEN, NUM_CLASSES), jnp.float32, -bound2, bound2)
    b2 = jax.random.uniform(k4, (NUM_CLASSES,), jnp.float32, -bound2, bound2)

    # One-time weight prep (padding / casting hoisted out of the forward path).
    params = prepare_params(w1, b1, w2, b2)

    out = simple_nn_forward(x, params)
    out = jax.block_until_ready(out)

    assert out.shape == (B, NUM_CLASSES)
    assert not bool(jnp.any(jnp.isnan(out)))

    # Matched reference: same bf16 dot inputs + f32 accumulation -> tight check.
    ref_matched = reference_forward(x, w1, b1, w2, b2, compute_dtype=jnp.bfloat16)
    assert jnp.allclose(out, ref_matched, atol=1e-3, rtol=1e-3), \
        "mismatch vs matched bf16 reference"

    # Full-f32 reference -> loose check (only dot inputs are bf16 in the kernel).
    ref_f32 = reference_forward(x, w1, b1, w2, b2, compute_dtype=jnp.float32)
    assert jnp.allclose(out, ref_f32, atol=5e-2, rtol=5e-2), \
        "mismatch vs f32 reference"

    print("KERNEL_OK")
</pallas_src>

<mosaic_0001>
module attributes {stable_mosaic.version = 11 : i64} {
  func.func @simple_nn_kernel(%arg0: i32, %arg1: memref<8x32xbf16, #tpu.memory_space<vmem>>, %arg2: memref<32x128xbf16, #tpu.memory_space<vmem>>, %arg3: memref<1x128xf32, #tpu.memory_space<vmem>>, %arg4: memref<128x128xbf16, #tpu.memory_space<vmem>>, %arg5: memref<1x128xf32, #tpu.memory_space<vmem>>, %arg6: memref<8x128xf32, #tpu.memory_space<vmem>>) attributes {dimension_semantics = [#tpu.dimension_semantics<parallel>], iteration_bounds = array<i64: 1>, scalar_prefetch = 0 : i64, scratch_operands = 0 : i64, tpu.core_type = #tpu.core_type<tc>, window_params = [{transform_indices = @transform_0, window_bounds = array<i64: 8, 32>}, {pipeline_mode = #tpu.pipeline_mode<synchronous>, transform_indices = @transform_1, window_bounds = array<i64: 32, 128>}, {pipeline_mode = #tpu.pipeline_mode<synchronous>, transform_indices = @transform_2, window_bounds = array<i64: 1, 128>}, {pipeline_mode = #tpu.pipeline_mode<synchronous>, transform_indices = @transform_3, window_bounds = array<i64: 128, 128>}, {pipeline_mode = #tpu.pipeline_mode<synchronous>, transform_indices = @transform_4, window_bounds = array<i64: 1, 128>}, {transform_indices = @transform_5, window_bounds = array<i64: 8, 128>}]} {
    %c0 = arith.constant 0 : index
    %c0_0 = arith.constant 0 : index
    %0 = vector.load %arg1[%c0, %c0_0] : memref<8x32xbf16, #tpu.memory_space<vmem>>, vector<8x32xbf16>
    %c0_1 = arith.constant 0 : index
    %c0_2 = arith.constant 0 : index
    %1 = vector.load %arg2[%c0_1, %c0_2] : memref<32x128xbf16, #tpu.memory_space<vmem>>, vector<32x128xbf16>
    %cst = arith.constant dense<0.000000e+00> : vector<8x128xf32>
    %2 = tpu.matmul %0, %1, %cst {dimension_numbers = #tpu.dot_dimension_numbers<[1], [0], [0], [1], [0, 0, 1, 1], [], []>} : vector<8x32xbf16>, vector<32x128xbf16>, vector<8x128xf32> -> vector<8x128xf32>
    %c0_3 = arith.constant 0 : index
    %c0_4 = arith.constant 0 : index
    %3 = vector.load %arg3[%c0_3, %c0_4] : memref<1x128xf32, #tpu.memory_space<vmem>>, vector<1x128xf32>
    %4 = vector.broadcast %3 : vector<1x128xf32> to vector<8x128xf32>
    %5 = arith.addf %2, %4 : vector<8x128xf32>
    %cst_5 = arith.constant 0.000000e+00 : f32
    %6 = vector.broadcast %cst_5 : f32 to vector<8x128xf32>
    %7 = arith.maximumf %5, %6 : vector<8x128xf32>
    %8 = arith.truncf %7 : vector<8x128xf32> to vector<8x128xbf16>
    %c0_6 = arith.constant 0 : index
    %c0_7 = arith.constant 0 : index
    %9 = vector.load %arg4[%c0_6, %c0_7] : memref<128x128xbf16, #tpu.memory_space<vmem>>, vector<128x128xbf16>
    %cst_8 = arith.constant dense<0.000000e+00> : vector<8x128xf32>
    %10 = tpu.matmul %8, %9, %cst_8 {dimension_numbers = #tpu.dot_dimension_numbers<[1], [0], [0], [1], [0, 0, 1, 1], [], []>} : vector<8x128xbf16>, vector<128x128xbf16>, vector<8x128xf32> -> vector<8x128xf32>
    %c0_9 = arith.constant 0 : index
    %c0_10 = arith.constant 0 : index
    %11 = vector.load %arg5[%c0_9, %c0_10] : memref<1x128xf32, #tpu.memory_space<vmem>>, vector<1x128xf32>
    %12 = vector.broadcast %11 : vector<1x128xf32> to vector<8x128xf32>
    %13 = arith.addf %10, %12 : vector<8x128xf32>
    %cst_11 = arith.constant dense<0xFF800000> : vector<8xf32>
    %14 = vector.multi_reduction <maximumf>, %13, %cst_11 [1] : vector<8x128xf32> to vector<8xf32>
    %15 = vector.shape_cast %14 : vector<8xf32> to vector<8x1xf32>
    %16 = vector.broadcast %15 : vector<8x1xf32> to vector<8x128xf32>
    %17 = arith.subf %13, %16 : vector<8x128xf32>
    %18 = math.exp %17 : vector<8x128xf32>
    %cst_12 = arith.constant dense<0.000000e+00> : vector<8xf32>
    %19 = vector.multi_reduction <add>, %18, %cst_12 [1] : vector<8x128xf32> to vector<8xf32>
    %20 = vector.shape_cast %19 : vector<8xf32> to vector<8x1xf32>
    %21 = math.log %20 : vector<8x1xf32>
    %22 = vector.broadcast %21 : vector<8x1xf32> to vector<8x128xf32>
    %23 = arith.subf %17, %22 : vector<8x128xf32>
    %c0_13 = arith.constant 0 : index
    %c0_14 = arith.constant 0 : index
    %24 = vector.load %arg6[%c0_13, %c0_14] : memref<8x128xf32, #tpu.memory_space<vmem>>, vector<8x128xf32>
    tpu.vector_store %arg6[%c0_13, %c0_14], %23 {strides = array<i32>} : memref<8x128xf32, #tpu.memory_space<vmem>>, vector<8x128xf32>,
    return
  }
  func.func @transform_0(%arg0: i32) -> (i32, i32) {
    %c0_i32 = arith.constant 0 : i32
    %c0_i32_0 = arith.constant 0 : i32
    return %arg0, %c0_i32 : i32, i32
  }
  func.func @transform_1(%arg0: i32) -> (i32, i32) {
    %c0_i32 = arith.constant 0 : i32
    %c0_i32_0 = arith.constant 0 : i32
    %c0_i32_1 = arith.constant 0 : i32
    return %c0_i32, %c0_i32_0 : i32, i32
  }
  func.func @transform_2(%arg0: i32) -> (i32, i32) {
    %c0_i32 = arith.constant 0 : i32
    %c0_i32_0 = arith.constant 0 : i32
    %c0_i32_1 = arith.constant 0 : i32
    return %c0_i32, %c0_i32_0 : i32, i32
  }
  func.func @transform_3(%arg0: i32) -> (i32, i32) {
    %c0_i32 = arith.constant 0 : i32
    %c0_i32_0 = arith.constant 0 : i32
    %c0_i32_1 = arith.constant 0 : i32
    return %c0_i32, %c0_i32_0 : i32, i32
  }
  func.func @transform_4(%arg0: i32) -> (i32, i32) {
    %c0_i32 = arith.constant 0 : i32
    %c0_i32_0 = arith.constant 0 : i32
    %c0_i32_1 = arith.constant 0 : i32
    return %c0_i32, %c0_i32_0 : i32, i32
  }
  func.func @transform_5(%arg0: i32) -> (i32, i32) {
    %c0_i32 = arith.constant 0 : i32
    %c0_i32_0 = arith.constant 0 : i32
    return %arg0, %c0_i32 : i32, i32
  }
}

</mosaic_0001>

<bundles_post_ra>
// kernel: tpu_custom_call.1
= control target key start
LH: loop header
LB: loop body
LE: loop exit
PB: predicated region body
PF: predicated region fallthrough
CT: control target
= control target key end

     0   :  { %10 = vsyncpa [#allocation3], 0  ;;  %s536_s0 = inlined_call_operand.hbm [shape: bf16[8,32], index: 0, kind: input, shape index: {}]   ;;  %s537_s1 = inlined_call_operand.hbm [shape: bf16[32,128], index: 1, kind: input, shape index: {}]   ;;  %s538_s2 = inlined_call_operand.vmem [shape: f32[1,128], index: 2, kind: input, shape index: {}]   ;;  %s539_s3 = inlined_call_operand.hbm [shape: bf16[128,128], index: 3, kind: input, shape index: {}]   ;;  %s540_s4 = inlined_call_operand.vmem [shape: f32[1,128], index: 4, kind: input, shape index: {}]   ;;  %s541_s5 = inlined_call_operand.hbm [shape: f32[8,128], index: 5, kind: output, shape index: {}]  }
   0x1   :  { %11 = vsyncpa [#allocation6], 0 }
   0x2   :  { %12 = vsyncpa [#allocation4], 0  ;;  %s438_s18 = smov [#allocation5]   ;;  %s344_s22 = scalar_lea.hbm %s537_s1, 256 }
   0x3   :  { %s28_s19 = sshll.u32 %s438_s18, 4  ;;  %p345_p0 = scmp.ne.s32.totalorder %s537_s1, %s344_s22  ;;  %s29_s19 = int_to_ptr.vmem [resolvable:$true] %s28_s19 }
   0x4   :  { %p348_p1 = scmp.lt.u32.totalorder %s344_s22, %s537_s1 }
   0x6   :  { %p350_p2 = pnand %p348_p1, %p345_p0 }
   0x8   :  { %353 = shalt.err (!%p350_p2)
}
   0x9   :  { %s354_s27 = scalar_lea.vmem %s29_s19, 256  ;;  %p359_p4 = scmp.lt.s32.totalorder %s29_s19, %s29_s19 }
   0xa   :  { %p355_p3 = scmp.ne.s32.totalorder %s29_s19, %s354_s27  ;;  %p360_p5 = scmp.lt.s32.totalorder %s354_s27, %s354_s27 }
   0xc   :  { %p361_p6 = por %p360_p5, %p359_p4 }
   0xe   :  { %p362_p7 = pnand %p361_p6, %p355_p3 }
  0x10   :  { %365 = shalt.err (!%p362_p7)
}
  0x11   :  { %s439_s28 = smov 64   ;;  %s440_s29 = smov 4  }
  0x12   :  { %34 = dma.hbm_to_vmem [thread:$0]  %s537_s1, 256, %s29_s19, [#allocation6], %s439_s28, %s439_s28, %s440_s29  }
  0x13   :  { %s441_s7 = smov [#allocation2]   ;;  %s442_s9 = smov [#allocation7]  }
  0x14   :  { %s19_s8 = sshll.u32 %s441_s7, 4  ;;  %s42_s10 = sshll.u32 %s442_s9, 4  ;;  %s20_s8 = int_to_ptr.vmem [resolvable:$true] %s19_s8  ;;  %s43_s10 = int_to_ptr.vmem [resolvable:$true] %s42_s10 }
  0x15   :  { %s366_s13 = scalar_lea.hbm %s536_s0, 64 }
  0x16   :  { %p367_p8 = scmp.ne.s32.totalorder %s536_s0, %s366_s13  ;;  %p370_p9 = scmp.lt.u32.totalorder %s366_s13, %s536_s0 }
  0x18   :  { %p372_p10 = pnand %p370_p9, %p367_p8 }
  0x1a   :  { %375 = shalt.err (!%p372_p10)
}
  0x1b   :  { %s376_s1 = scalar_lea.vmem %s20_s8, 64  ;;  %p381_p12 = scmp.lt.s32.totalorder %s20_s8, %s20_s8 }
  0x1c   :  { %p377_p11 = scmp.ne.s32.totalorder %s20_s8, %s376_s1  ;;  %p382_p13 = scmp.lt.s32.totalorder %s376_s1, %s376_s1 }
  0x1e   :  { %p383_p0 = por %p382_p13, %p381_p12 }
  0x20   :  { %p384_p1 = pnand %p383_p0, %p377_p11 }
  0x22   :  { %387 = shalt.err (!%p384_p1)
}
  0x23   :  { %22 = dma.hbm_to_vmem [thread:$0]  %s536_s0, 64, %s20_s8, [#allocation3]  }
  0x24   :  { %s388_s22 = scalar_lea.hbm %s539_s3, 1024 }
  0x25   :  { %p389_p2 = scmp.ne.s32.totalorder %s539_s3, %s388_s22  ;;  %p392_p3 = scmp.lt.u32.totalorder %s388_s22, %s539_s3 }
  0x27   :  { %p394_p4 = pnand %p392_p3, %p389_p2 }
  0x29   :  { %397 = shalt.err (!%p394_p4)
}
  0x2a   :  { %s398_s27 = scalar_lea.vmem %s43_s10, 1024  ;;  %p403_p6 = scmp.lt.s32.totalorder %s43_s10, %s43_s10 }
  0x2b   :  { %p399_p5 = scmp.ne.s32.totalorder %s43_s10, %s398_s27  ;;  %p404_p7 = scmp.lt.s32.totalorder %s398_s27, %s398_s27 }
  0x2d   :  { %p405_p8 = por %p404_p7, %p403_p6 }
  0x2f   :  { %p406_p9 = pnand %p405_p8, %p399_p5 }
  0x31   :  { %409 = shalt.err (!%p406_p9)
}
  0x32   :  { %48 = dma.hbm_to_vmem [thread:$0]  %s539_s3, 1024, %s43_s10, [#allocation6], %s439_s28, %s439_s28, %s440_s29  }
  0x33   :  { %432 = dma.done.wait [#allocation3], 64  }
  0x34   :  { %433 = vsyncadd [#allocation3], 4294967232 }
  0x35   :  { %434 = dma.done.wait [#allocation6], 1280  }
  0x36   :  { %435 = vsyncadd [#allocation6], 4294966016  ;;  %v443_v0 = vmov 0.0   ;;  %vm444_vm0 = vmmov 0   ;;  %v330_v1 = vld [vmem:[#allocation5] sm:$0xff]   ;;  %v331_v2 = vld [vmem:[#allocation5 + $0x8] sm:$0xff]  }
  0x37   :  { %294 = vmatprep.subr.bf16.mxu0 %v443_v0  ;;  %298 = vmatprep.mubr.msk.bf16.mxu0 %vm444_vm0, %v443_v0  ;;  %v332_v3 = vld [vmem:[#allocation7] sm:$0xff]   ;;  %vm85_vm1 = vcmask 261120   ;;  %v333_v4 = vld [vmem:[#allocation7 + $0x8] sm:$0xff]   ;;  %v334_v6 = vld [vmem:[#allocation7 + $0x10] sm:$0xff]  }
  0x38   :  { %302 = vmatprep.subr.bf16.mxu1 %v443_v0  ;;  %318 = vmatprep.mubr.msk.bf16.mxu1 %vm444_vm0, %v443_v0  ;;  %v61_v5 = vld [vmem:[#allocation2] sm:$0xf]  ;;  %v335_v7 = vld [vmem:[#allocation7 + $0x18] sm:$0xff]   ;;  %v336_v8 = vld [vmem:[#allocation7 + $0x20] sm:$0xff]  }
  0x39   :  { %295 = vmatpush3.bf16.msra.mxu0 %v330_v1  ;;  %303 = vmatpush3.bf16.msra.mxu1 %v332_v3  ;;  %v337_v9 = vld [vmem:[#allocation7 + $0x28] sm:$0xff]   ;;  %v338_v10 = vld [vmem:[#allocation7 + $0x30] sm:$0xff]   ;;  %v339_v11 = vld [vmem:[#allocation7 + $0x38] sm:$0xff]  }
  0x3a   :  { %296 = vmatprep.subr.bf16.mxu0 %v443_v0  ;;  %304 = vmatprep.subr.bf16.mxu1 %v443_v0  ;;  %v269_v12 = vld [vmem:[%s538_s2] ss:$0 sm:$0xff]  ;;  %s445_s2 = smov [#allocation8]  }
  0x3b   :  { %v273_v20 = vld [vmem:[%s540_s4] ss:$0 sm:$0xff]  ;;  %s259_s7 = sshll.u32 %s445_s2, 4  ;;  %s260_s7 = int_to_ptr.vmem [resolvable:$true] %s259_s7 }
  0x3c   :  { %s410_s4 = scalar_lea.vmem %s260_s7, 128  ;;  %p415_p11 = scmp.lt.s32.totalorder %s260_s7, %s260_s7 }
  0x3d   :  { %297 = vmatpush3.bf16.msra.mxu0 %v331_v2  ;;  %305 = vmatpush3.bf16.msra.mxu1 %v333_v4  ;;  %p411_p10 = scmp.ne.s32.totalorder %s260_s7, %s410_s4  ;;  %p416_p12 = scmp.lt.s32.totalorder %s410_s4, %s410_s4 }
  0x3e   :  { %306 = vmatprep.subr.bf16.mxu1 %v443_v0 }
  0x3f   :  { %p417_p13 = por %p416_p12, %p415_p11 }
  0x40   :  { %299 = vmatmul.mubr.msk.bf16.vlgmr.msra.gmra.mrb[0].mxu0 %vm85_vm1, %v61_v5 }
  0x41   :  { %307 = vmatpush3.bf16.msra.mxu1 %v334_v6  ;;  %p418_p0 = pnand %p417_p13, %p411_p10 }
  0x42   :  { %308 = vmatprep.subr.bf16.mxu1 %v443_v0 }
  0x45   :  { %309 = vmatpush3.bf16.msra.mxu1 %v335_v7 }
  0x46   :  { %310 = vmatprep.subr.bf16.mxu1 %v443_v0 }
  0x49   :  { %311 = vmatpush3.bf16.msra.mxu1 %v336_v8 }
  0x4a   :  { %312 = vmatprep.subr.bf16.mxu1 %v443_v0 }
  0x4d   :  { %313 = vmatpush3.bf16.msra.mxu1 %v337_v9 }
  0x4e   :  { %314 = vmatprep.subr.bf16.mxu1 %v443_v0 }
  0x51   :  { %315 = vmatpush3.bf16.msra.mxu1 %v338_v10 }
  0x52   :  { %316 = vmatprep.subr.bf16.mxu1 %v443_v0 }
  0x55   :  { %317 = vmatpush3.bf16.msra.mxu1 %v339_v11 }
 0x113   :  { %v123_v13 = vpop.f32.mrb[0].mxu0 }
 0x114   :  { %v124_v14 = vadd.f32 %v269_v12, %v123_v13  ;;  %v300_v15 = vpop.f32.mrb[1].mxu0 }
 0x115   :  { %v126_v16 = vpop.f32.mrb[2].mxu0 }
 0x116   :  { %v129_v17 = vmax.f32 %v124_v14, 0.0  ;;  %v301_v18 = vpop.f32.mrb[3].mxu0 }
 0x118   :  { %v130_v19 = vpack.c.bf16 %v129_v17, %v129_v17 }
 0x11a   :  { %319 = vmatmul.mubr.bf16.vlgmr.msra.gmra.mrb[0].mxu1 %v130_v19 }
 0x1ed   :  { %v236_v21 = vpop.f32.mrb[0].mxu1 }
 0x1ee   :  { %v237_v22 = vadd.f32 %v273_v20, %v236_v21  ;;  %v320_v23 = vpop.f32.mrb[1].mxu1 }
 0x1ef   :  { %v239_v24 = vpop.f32.mrb[2].mxu1 }
 0x1f0   :  { %242 = vmax.xlane.f32.xlu0 %v237_v22  ;;  %v321_v25 = vpop.f32.mrb[3].mxu1 }
 0x27d   :  { %v243_v26 = vpop.xlane.xlu0 %242 }
 0x27e   :  { %v244_v27 = vsub.f32 %v237_v22, %v243_v26 }
 0x280   :  { %v245_v28 = vmul.f32 1.442695, %v244_v27 }
 0x282   :  { %340 = vpow2.f32 %v245_v28 }
 0x28c   :  { %v341_v29 = vpop.eup %340 }
 0x28d   :  { %247 = vadd.xlane.f32.xlu0 %v341_v29 }
 0x31a   :  { %v248_v30 = vpop.xlane.xlu0 %247 }
 0x31b   :  { %342 = vlog2.f32 %v248_v30 }
 0x325   :  { %v343_v31 = vpop.eup %342 }
 0x326   :  { %v250_v32 = vmul.f32 0.6931472, %v343_v31 }
 0x328   :  { %v251_v33 = vsub.f32 %v244_v27, %v250_v32 }
 0x32a   :  { %252 = vst [vmem:[#allocation8] sm:$0xff] %v251_v33 }
 0x32b   :  { %421 = shalt.err (!%p418_p0)
}
 0x32c   :  { %s422_s10 = scalar_lea.hbm %s541_s5, 128 }
 0x32d   :  { %p423_p1 = scmp.ne.s32.totalorder %s541_s5, %s422_s10  ;;  %p426_p2 = scmp.lt.u32.totalorder %s422_s10, %s541_s5 }
 0x32f   :  { %p428_p3 = pnand %p426_p2, %p423_p1 }
 0x331   :  { %431 = shalt.err (!%p428_p3)
}
 0x332   :  { %262 = dma.vmem_to_hbm [thread:$0]  %s260_s7, 128, %s541_s5, [#allocation4]  }
 0x333   :  { %436 = dma.done.wait [#allocation4], 128  }
 0x334   :  { %437 = vsyncadd [#allocation4], 4294967168 }
 0x335   :  { %266 = vsyncpa [#allocation3], 1 }
 0x336   :  { %267 = vsyncpa [#allocation6], 1 }
 0x337   :  { %268 = vsyncpa [#allocation4], 1 }

</bundles_post_ra>
